<compile_context>
chip_gen: v5e
topology: v5e:2x2
jax: 0.10.0
libtpu: 0.0.40
codegen_flags: <defaults>
</compile_context>

<pallas_src>
import math

import jax
import jax.numpy as jnp
from jax.experimental import pallas as pl
from jax.experimental.pallas import tpu as pltpu

_SQRT_2_OVER_PI = 0.7978845608028654
_GELU_C = 0.044715

# Gridless / VMEM-resident cutoff (bytes of the f32 slab).
_RESIDENT_BYTES = 4 * 1024 * 1024
# Target tiled block size (bytes); 4 double-buffered copies stay << 16 MiB.
_TARGET_BLOCK_BYTES = 2 * 1024 * 1024


def _double_tanh_kernel(x_ref, o_ref):
    x = x_ref[...]
    # Op-for-op mirror of the PyTorch graph (first tanh block).
    v1 = x * 0.5
    v2 = v1 * v1
    v3 = v2 * v1
    v4 = v3 * _GELU_C
    v5 = x + v4
    v7 = jnp.tanh(v5 * _SQRT_2_OVER_PI)
    v8 = v7 + 1.0
    # Second tanh block applied to v8.
    v9 = v8 * 0.5
    v10 = v8 * v8
    v11 = v10 * v8
    v12 = v11 * _GELU_C
    v13 = v8 + v12
    v15 = jnp.tanh(v13 * _SQRT_2_OVER_PI)
    v16 = v15 + 1.0
    o_ref[...] = v9 * v16


def _pick_lane(padded_total):
    """Widest lane-dense last dim (multiple of 128) keeping rows % 8 == 0."""
    for cand in (8192, 4096, 2048, 1024, 512, 256):
        if padded_total % cand == 0 and (padded_total // cand) % 8 == 0:
            return cand
    return 128


def _pick_tile_rows(rows, lane):
    """Largest multiple-of-8 divisor of `rows` giving a block <= ~2 MiB."""
    bytes_per_row = lane * 4
    max_rows = max(8, (_TARGET_BLOCK_BYTES // bytes_per_row) // 8 * 8)
    best = 8
    tr = 8
    while tr <= min(rows, max_rows):
        if rows % tr == 0:
            best = tr
        tr += 8
    return best


@jax.jit
def model_forward(x1):
    """x1: (N, C, H, W) float32 — reproduces Model.forward exactly."""
    orig_shape = x1.shape
    total = math.prod(orig_shape)

    flat = x1.reshape(-1)
    padded = ((total + 127) // 128) * 128
    if padded != total:
        # TODO(synk): replace pad + final slice with an in-kernel masked tail
        # tile for non-aligned sizes (saves two HBM passes).
        flat = jnp.pad(flat, (0, padded - total))

    lane = _pick_lane(padded)
    rows = padded // lane
    x2d = flat.reshape(rows, lane)

    slab_bytes = rows * lane * x2d.dtype.itemsize

    if slab_bytes <= _RESIDENT_BYTES:
        # Small case: gridless, whole slab resident in VMEM (no pipeline
        # prologue/epilogue overhead).
        out2d = pl.pallas_call(
            _double_tanh_kernel,
            out_shape=jax.ShapeDtypeStruct((rows, lane), x1.dtype),
            in_specs=[pl.BlockSpec(memory_space=pltpu.MemorySpace.VMEM)],
            out_specs=pl.BlockSpec(memory_space=pltpu.MemorySpace.VMEM),
        )(x2d)
    else:
        # Large case: row-tiled, lane-dense blocks, HBM-roofline friendly.
        tr = _pick_tile_rows(rows, lane)
        out2d = pl.pallas_call(
            _double_tanh_kernel,
            out_shape=jax.ShapeDtypeStruct((rows, lane), x1.dtype),
            grid=(rows // tr,),
            in_specs=[pl.BlockSpec((tr, lane), lambda i: (i, 0))],
            out_specs=pl.BlockSpec((tr, lane), lambda i: (i, 0)),
            compiler_params=pltpu.CompilerParams(
                dimension_semantics=("parallel",),
                # Blocks sized so 4 pipeline buffers fit even v5e's default
                # scoped VMEM; keep an explicit cap for safety.
                vmem_limit_bytes=16 * 1024 * 1024,
            ),
        )(x2d)

    out_flat = out2d.reshape(-1)
    if padded != total:
        out_flat = out_flat[:total]
    return out_flat.reshape(orig_shape)


def _reference(x):
    # Pure-JAX reference mirroring the PyTorch graph op-for-op.
    v1 = x * 0.5
    v2 = v1 * v1
    v3 = v2 * v1
    v4 = v3 * 0.044715
    v5 = x + v4
    v6 = v5 * 0.7978845608028654
    v7 = jnp.tanh(v6)
    v8 = v7 + 1.0
    v9 = v8 * 0.5
    v10 = v8 * v8
    v11 = v10 * v8
    v12 = v11 * 0.044715
    v13 = v8 + v12
    v14 = v13 * 0.7978845608028654
    v15 = jnp.tanh(v14)
    v16 = v15 + 1.0
    return v9 * v16


if __name__ == "__main__":
    key = jax.random.PRNGKey(0)
    # Matches the module's example input shape (1, 64, 16, 16).
    x1 = jax.random.normal(key, (1, 64, 16, 16), dtype=jnp.float32)

    ref = _reference(x1)

    out = model_forward(x1)
    jax.block_until_ready(out)

    assert out.shape == x1.shape
    assert out.dtype == x1.dtype
    assert jnp.allclose(out, ref, atol=1e-5, rtol=1e-5)

    print("KERNEL_OK")
</pallas_src>

<mosaic_0001>
module attributes {stable_mosaic.version = 11 : i64} {
  func.func @_double_tanh_kernel(%arg0: memref<8x2048xf32, #tpu.memory_space<vmem>>, %arg1: memref<8x2048xf32, #tpu.memory_space<vmem>>) attributes {dimension_semantics = [], scalar_prefetch = 0 : i64, scratch_operands = 0 : i64, tpu.core_type = #tpu.core_type<tc>} {
    %c0 = arith.constant 0 : index
    %c0_0 = arith.constant 0 : index
    %0 = vector.load %arg0[%c0, %c0_0] : memref<8x2048xf32, #tpu.memory_space<vmem>>, vector<8x2048xf32>
    %cst = arith.constant 5.000000e-01 : f32
    %1 = vector.broadcast %cst : f32 to vector<8x2048xf32>
    %2 = arith.mulf %0, %1 : vector<8x2048xf32>
    %3 = arith.mulf %2, %2 : vector<8x2048xf32>
    %4 = arith.mulf %3, %2 : vector<8x2048xf32>
    %cst_1 = arith.constant 4.471500e-02 : f32
    %5 = vector.broadcast %cst_1 : f32 to vector<8x2048xf32>
    %6 = arith.mulf %4, %5 : vector<8x2048xf32>
    %7 = arith.addf %0, %6 : vector<8x2048xf32>
    %cst_2 = arith.constant 0.797884583 : f32
    %8 = vector.broadcast %cst_2 : f32 to vector<8x2048xf32>
    %9 = arith.mulf %7, %8 : vector<8x2048xf32>
    %10 = math.tanh %9 : vector<8x2048xf32>
    %cst_3 = arith.constant 1.000000e+00 : f32
    %11 = vector.broadcast %cst_3 : f32 to vector<8x2048xf32>
    %12 = arith.addf %10, %11 : vector<8x2048xf32>
    %cst_4 = arith.constant 5.000000e-01 : f32
    %13 = vector.broadcast %cst_4 : f32 to vector<8x2048xf32>
    %14 = arith.mulf %12, %13 : vector<8x2048xf32>
    %15 = arith.mulf %12, %12 : vector<8x2048xf32>
    %16 = arith.mulf %15, %12 : vector<8x2048xf32>
    %cst_5 = arith.constant 4.471500e-02 : f32
    %17 = vector.broadcast %cst_5 : f32 to vector<8x2048xf32>
    %18 = arith.mulf %16, %17 : vector<8x2048xf32>
    %19 = arith.addf %12, %18 : vector<8x2048xf32>
    %cst_6 = arith.constant 0.797884583 : f32
    %20 = vector.broadcast %cst_6 : f32 to vector<8x2048xf32>
    %21 = arith.mulf %19, %20 : vector<8x2048xf32>
    %22 = math.tanh %21 : vector<8x2048xf32>
    %cst_7 = arith.constant 1.000000e+00 : f32
    %23 = vector.broadcast %cst_7 : f32 to vector<8x2048xf32>
    %24 = arith.addf %22, %23 : vector<8x2048xf32>
    %25 = arith.mulf %14, %24 : vector<8x2048xf32>
    %c0_8 = arith.constant 0 : index
    %c0_9 = arith.constant 0 : index
    %26 = vector.load %arg1[%c0_8, %c0_9] : memref<8x2048xf32, #tpu.memory_space<vmem>>, vector<8x2048xf32>
    tpu.vector_store %arg1[%c0_8, %c0_9], %25 {strides = array<i32>} : memref<8x2048xf32, #tpu.memory_space<vmem>>, vector<8x2048xf32>,
    return
  }
}

</mosaic_0001>

<bundles_post_ra>
// kernel: model_forward.1
= control target key start
LH: loop header
LB: loop body
LE: loop exit
PB: predicated region body
PF: predicated region fallthrough
CT: control target
= control target key end

     0   :  { %s584_s0 = inlined_call_operand.vmem [shape: f32[8,2048], index: 0, kind: input, shape index: {}]   ;;  %s585_s1 = inlined_call_operand.vmem [shape: f32[8,2048], index: 1, kind: output, shape index: {}]  }
   0x1   :  { %v8_v0 = vld [vmem:[%s584_s0] sm:$0xff]  ;;  %v9_v1 = vld [vmem:[%s584_s0 + $0x8] sm:$0xff]  ;;  %v10_v2 = vld [vmem:[%s584_s0 + $0x10] sm:$0xff] }
   0x2   :  { %v24_v3 = vmul.f32 0.5, %v8_v0  ;;  %v25_v4 = vmul.f32 0.5, %v9_v1  ;;  %v26_v5 = vmul.f32 0.5, %v10_v2  ;;  %v11_v6 = vld [vmem:[%s584_s0 + $0x18] sm:$0xff]  ;;  %v12_v7 = vld [vmem:[%s584_s0 + $0x20] sm:$0xff]  ;;  %v13_v8 = vld [vmem:[%s584_s0 + $0x28] sm:$0xff] }
   0x3   :  { %v27_v9 = vmul.f32 0.5, %v11_v6  ;;  %v28_v10 = vmul.f32 0.5, %v12_v7  ;;  %v29_v11 = vmul.f32 0.5, %v13_v8  ;;  %v14_v12 = vld [vmem:[%s584_s0 + $0x30] sm:$0xff]  ;;  %v15_v13 = vld [vmem:[%s584_s0 + $0x38] sm:$0xff]  ;;  %v16_v42 = vld [vmem:[%s584_s0 + $0x40] sm:$0xff] }
   0x4   :  { %v40_v14 = vmul.f32 %v24_v3, %v24_v3  ;;  %v41_v15 = vmul.f32 %v25_v4, %v25_v4  ;;  %v42_v16 = vmul.f32 %v26_v5, %v26_v5  ;;  %v30_v17 = vmul.f32 0.5, %v14_v12  ;;  %v17_v43 = vld [vmem:[%s584_s0 + $0x48] sm:$0xff]  ;;  %v18_v48 = vld [vmem:[%s584_s0 + $0x50] sm:$0xff]  ;;  %v426_v49 = vld [vmem:[%s584_s0 + $0x58] sm:$0xff] }
   0x5   :  { %v43_v18 = vmul.f32 %v27_v9, %v27_v9  ;;  %v44_v19 = vmul.f32 %v28_v10, %v28_v10  ;;  %v45_v20 = vmul.f32 %v29_v11, %v29_v11  ;;  %v31_v21 = vmul.f32 0.5, %v15_v13  ;;  %v431_v50 = vld [vmem:[%s584_s0 + $0x60] sm:$0xff]  ;;  %v436_v62 = vld [vmem:[%s584_s0 + $0x68] sm:$0xff] }
   0x6   :  { %v56_v22 = vmul.f32 %v40_v14, %v24_v3  ;;  %v57_v23 = vmul.f32 %v41_v15, %v25_v4  ;;  %v58_v24 = vmul.f32 %v42_v16, %v26_v5  ;;  %v46_v25 = vmul.f32 %v30_v17, %v30_v17 }
   0x7   :  { %v59_v26 = vmul.f32 %v43_v18, %v27_v9  ;;  %v60_v27 = vmul.f32 %v44_v19, %v28_v10  ;;  %v61_v28 = vmul.f32 %v45_v20, %v29_v11  ;;  %v47_v29 = vmul.f32 %v31_v21, %v31_v21 }
   0x8   :  { %v72_v30 = vmul.f32 0.044715, %v56_v22  ;;  %v73_v31 = vmul.f32 0.044715, %v57_v23  ;;  %v74_v32 = vmul.f32 0.044715, %v58_v24  ;;  %v62_v33 = vmul.f32 %v46_v25, %v30_v17 }
   0x9   :  { %v75_v34 = vmul.f32 0.044715, %v59_v26  ;;  %v76_v35 = vmul.f32 0.044715, %v60_v27  ;;  %v77_v36 = vmul.f32 0.044715, %v61_v28  ;;  %v63_v37 = vmul.f32 %v47_v29, %v31_v21 }
   0xa   :  { %v88_v38 = vadd.f32 %v72_v30, %v8_v0  ;;  %v89_v39 = vadd.f32 %v73_v31, %v9_v1  ;;  %v90_v40 = vadd.f32 %v74_v32, %v10_v2  ;;  %v78_v41 = vmul.f32 0.044715, %v62_v33 }
   0xb   :  { %v91_v44 = vadd.f32 %v75_v34, %v11_v6  ;;  %v92_v45 = vadd.f32 %v76_v35, %v12_v7  ;;  %v93_v46 = vadd.f32 %v77_v36, %v13_v8  ;;  %v79_v47 = vmul.f32 0.044715, %v63_v37 }
   0xc   :  { %v104_v51 = vmul.f32 0.7978846, %v88_v38  ;;  %v105_v52 = vmul.f32 0.7978846, %v89_v39  ;;  %v106_v53 = vmul.f32 0.7978846, %v90_v40  ;;  %v94_v54 = vadd.f32 %v78_v41, %v14_v12 }
   0xd   :  { %v107_v55 = vmul.f32 0.7978846, %v91_v44  ;;  %v108_v56 = vmul.f32 0.7978846, %v92_v45  ;;  %v109_v57 = vmul.f32 0.7978846, %v93_v46  ;;  %v95_v58 = vadd.f32 %v79_v47, %v15_v13 }
   0xe   :  { %316 = vtanh.f32 %v104_v51  ;;  %v110_v59 = vmul.f32 0.7978846, %v94_v54  ;;  %v32_v60 = vmul.f32 0.5, %v16_v42  ;;  %v33_v61 = vmul.f32 0.5, %v17_v43 }
   0xf   :  { %318 = vtanh.f32 %v105_v52  ;;  %v111_v63 = vmul.f32 0.7978846, %v95_v58  ;;  %v34_v0 = vmul.f32 0.5, %v18_v48  ;;  %v35_v1 = vmul.f32 0.5, %v426_v49 }
  0x10   :  { %320 = vtanh.f32 %v106_v53  ;;  %v48_v2 = vmul.f32 %v32_v60, %v32_v60  ;;  %v49_v3 = vmul.f32 %v33_v61, %v33_v61  ;;  %v36_v4 = vmul.f32 0.5, %v431_v50 }
  0x11   :  { %322 = vtanh.f32 %v107_v55  ;;  %v50_v5 = vmul.f32 %v34_v0, %v34_v0  ;;  %v51_v6 = vmul.f32 %v35_v1, %v35_v1  ;;  %v441_v7 = vmul.f32 0.5, %v436_v62 }
  0x12   :  { %324 = vtanh.f32 %v108_v56  ;;  %v64_v8 = vmul.f32 %v48_v2, %v32_v60  ;;  %v65_v9 = vmul.f32 %v49_v3, %v33_v61  ;;  %v52_v10 = vmul.f32 %v36_v4, %v36_v4 }
  0x13   :  { %326 = vtanh.f32 %v109_v57  ;;  %v66_v11 = vmul.f32 %v50_v5, %v34_v0  ;;  %v67_v12 = vmul.f32 %v51_v6, %v35_v1  ;;  %v445_v20 = vmul.f32 %v441_v7, %v441_v7 }
  0x14   :  { %v317_v13 = vpop.eup %316  ;;  %328 = vtanh.f32 %v110_v59  ;;  %v80_v14 = vmul.f32 0.044715, %v64_v8  ;;  %v81_v15 = vmul.f32 0.044715, %v65_v9  ;;  %v68_v16 = vmul.f32 %v52_v10, %v36_v4 }
  0x15   :  { %v319_v17 = vpop.eup %318  ;;  %v136_v18 = vadd.f32 1.0, %v317_v13  ;;  %v82_v19 = vmul.f32 0.044715, %v66_v11  ;;  %330 = vtanh.f32 %v111_v63  ;;  %v447_v24 = vmul.f32 0.044715, %v67_v12 }
  0x16   :  { %v321_v21 = vpop.eup %320  ;;  %v137_v22 = vadd.f32 1.0, %v319_v17  ;;  %v96_v23 = vadd.f32 %v80_v14, %v16_v42  ;;  %v97_v28 = vadd.f32 %v81_v15, %v17_v43  ;;  %v84_v29 = vmul.f32 0.044715, %v68_v16 }
  0x17   :  { %v323_v25 = vpop.eup %322  ;;  %v168_v26 = vmul.f32 %v136_v18, %v136_v18  ;;  %v138_v27 = vadd.f32 1.0, %v321_v21  ;;  %v449_v31 = vmul.f32 0.5, %v136_v18  ;;  %v98_v34 = vadd.f32 %v82_v19, %v18_v48  ;;  %v473_v19 = vld [vmem:[%s584_s0 + $0x70] sm:$0xff] }
  0x18   :  { %v325_v30 = vpop.eup %324  ;;  %v169_v32 = vmul.f32 %v137_v22, %v137_v22  ;;  %v139_v33 = vadd.f32 1.0, %v323_v25  ;;  %v451_v37 = vmul.f32 0.5, %v137_v22  ;;  %v112_v45 = vmul.f32 0.7978846, %v96_v23 }
  0x19   :  { %v327_v35 = vpop.eup %326  ;;  %v184_v36 = vmul.f32 %v168_v26, %v136_v18  ;;  %v170_v38 = vmul.f32 %v138_v27, %v138_v27  ;;  %v140_v39 = vadd.f32 1.0, %v325_v30  ;;  %v453_v43 = vmul.f32 0.5, %v138_v27 }
  0x1a   :  { %v329_v40 = vpop.eup %328  ;;  %v185_v41 = vmul.f32 %v169_v32, %v137_v22  ;;  %v171_v42 = vmul.f32 %v139_v33, %v139_v33  ;;  %v141_v44 = vadd.f32 1.0, %v327_v35  ;;  %v455_v54 = vmul.f32 0.5, %v139_v33 }
  0x1b   :  { %v200_v46 = vmul.f32 0.044715, %v184_v36  ;;  %v186_v47 = vmul.f32 %v170_v38, %v138_v27  ;;  %v172_v51 = vmul.f32 %v140_v39, %v140_v39  ;;  %v331_v52 = vpop.eup %330  ;;  %v457_v59 = vadd.f32 1.0, %v329_v40 }
  0x1c   :  { %v201_v53 = vmul.f32 0.044715, %v185_v41  ;;  %v187_v48 = vmul.f32 %v171_v42, %v139_v33  ;;  %v173_v55 = vmul.f32 %v141_v44, %v141_v44  ;;  %v459_v63 = vmul.f32 0.5, %v140_v39 }
  0x1d   :  { %v216_v56 = vadd.f32 %v200_v46, %v136_v18  ;;  %v202_v57 = vmul.f32 0.044715, %v186_v47  ;;  %v188_v58 = vmul.f32 %v172_v51, %v140_v39  ;;  %v461_v4 = vadd.f32 1.0, %v331_v52 }
  0x1e   :  { %v217_v60 = vadd.f32 %v201_v53, %v137_v22  ;;  %v203_v61 = vmul.f32 0.044715, %v187_v48  ;;  %v189_v0 = vmul.f32 %v173_v55, %v141_v44  ;;  %v174_v9 = vmul.f32 %v457_v59, %v457_v59 }
  0x1f   :  { %v232_v1 = vmul.f32 0.7978846, %v216_v56  ;;  %v218_v2 = vadd.f32 %v202_v57, %v138_v27  ;;  %v204_v3 = vmul.f32 0.044715, %v188_v58  ;;  %v465_v12 = vmul.f32 0.5, %v141_v44 }
  0x20   :  { %v233_v5 = vmul.f32 0.7978846, %v217_v60  ;;  %v219_v6 = vadd.f32 %v203_v61, %v139_v33  ;;  %v205_v8 = vmul.f32 0.044715, %v189_v0  ;;  %v190_v15 = vmul.f32 %v174_v9, %v457_v59  ;;  %v504_v60 = vld [vmem:[%s584_s0 + $0x78] sm:$0xff] }
  0x21   :  { %332 = vtanh.f32 %v232_v1  ;;  %v234_v10 = vmul.f32 0.7978846, %v218_v2  ;;  %v220_v11 = vadd.f32 %v204_v3, %v140_v39  ;;  %v175_v17 = vmul.f32 %v461_v4, %v461_v4 }
  0x22   :  { %334 = vtanh.f32 %v233_v5  ;;  %v235_v13 = vmul.f32 0.7978846, %v219_v6  ;;  %v221_v14 = vadd.f32 %v205_v8, %v141_v44  ;;  %v113_v18 = vmul.f32 0.7978846, %v97_v28 }
  0x23   :  { %336 = vtanh.f32 %v234_v10  ;;  %v236_v16 = vmul.f32 0.7978846, %v220_v11  ;;  %v206_v22 = vmul.f32 0.044715, %v190_v15  ;;  %v114_v23 = vmul.f32 0.7978846, %v98_v34 }
  0x24   :  { %338 = vtanh.f32 %v235_v13  ;;  %v237_v21 = vmul.f32 0.7978846, %v221_v14  ;;  %v191_v25 = vmul.f32 %v175_v17, %v461_v4  ;;  %v99_v26 = vadd.f32 %v447_v24, %v426_v49 }
  0x25   :  { %340 = vtanh.f32 %v236_v16  ;;  %v100_v27 = vadd.f32 %v84_v29, %v431_v50  ;;  %v222_v28 = vadd.f32 %v206_v22, %v457_v59  ;;  %v69_v30 = vmul.f32 %v445_v20, %v441_v7 }
  0x26   :  { %342 = vtanh.f32 %v237_v21  ;;  %v38_v32 = vmul.f32 0.5, %v473_v19  ;;  %v207_v35 = vmul.f32 0.044715, %v191_v25  ;;  %v115_v34 = vmul.f32 0.7978846, %v99_v26 }
  0x27   :  { %v333_v33 = vpop.eup %332  ;;  %344 = vtanh.f32 %v112_v45  ;;  %v116_v36 = vmul.f32 0.7978846, %v100_v27  ;;  %v238_v40 = vmul.f32 0.7978846, %v222_v28  ;;  %v85_v49 = vmul.f32 0.044715, %v69_v30 }
  0x28   :  { %v335_v38 = vpop.eup %334  ;;  %v264_v39 = vadd.f32 1.0, %v333_v33  ;;  %346 = vtanh.f32 %v113_v18  ;;  %v223_v29 = vadd.f32 %v207_v35, %v461_v4  ;;  %v54_v41 = vmul.f32 %v38_v32, %v38_v32 }
  0x29   :  { %v337_v24 = vpop.eup %336  ;;  %v265_v50 = vadd.f32 1.0, %v335_v38  ;;  %348 = vtanh.f32 %v114_v23  ;;  %v101_v44 = vadd.f32 %v85_v49, %v436_v62  ;;  %v158_v0 = vmul.f32 0.5, %v457_v59 }
  0x2a   :  { %v339_v42 = vpop.eup %338  ;;  %v280_v7 = vmul.f32 %v264_v39, %v449_v31  ;;  %v266_v20 = vadd.f32 1.0, %v337_v24  ;;  %350 = vtanh.f32 %v238_v40  ;;  %v239_v51 = vmul.f32 0.7978846, %v223_v29 }
  0x2b   :  { %v341_v45 = vpop.eup %340  ;;  %v281_v46 = vmul.f32 %v265_v50, %v451_v37  ;;  %v267_v47 = vadd.f32 1.0, %v339_v42  ;;  %352 = vtanh.f32 %v115_v34  ;;  %v117_v31 = vmul.f32 0.7978846, %v101_v44 }
  0x2c   :  { %v343_v52 = vpop.eup %342  ;;  %296 = vst [vmem:[%s585_s1] sm:$0xff] %v280_v7  ;;  %v282_v53 = vmul.f32 %v266_v20, %v453_v43  ;;  %v268_v48 = vadd.f32 1.0, %v341_v45  ;;  %354 = vtanh.f32 %v116_v36  ;;  %v70_v56 = vmul.f32 %v54_v41, %v38_v32 }
  0x2d   :  { %v345_v55 = vpop.eup %344  ;;  %297 = vst [vmem:[%s585_s1 + $0x8] sm:$0xff] %v281_v46  ;;  %v283_v62 = vmul.f32 %v267_v47, %v455_v54  ;;  %v269_v37 = vadd.f32 1.0, %v343_v52  ;;  %356 = vtanh.f32 %v239_v51  ;;  %v39_v10 = vmul.f32 0.5, %v504_v60 }
  0x2e   :  { %v347_v57 = vpop.eup %346  ;;  %298 = vst [vmem:[%s585_s1 + $0x10] sm:$0xff] %v282_v53  ;;  %v284_v43 = vmul.f32 %v268_v48, %v459_v63  ;;  %v499_v58 = vadd.f32 1.0, %v345_v55  ;;  %358 = vtanh.f32 %v117_v31  ;;  %v86_v63 = vmul.f32 0.044715, %v70_v56 }
  0x2f   :  { %v349_v61 = vpop.eup %348  ;;  %299 = vst [vmem:[%s585_s1 + $0x18] sm:$0xff] %v283_v62  ;;  %v285_v54 = vmul.f32 %v269_v37, %v465_v12  ;;  %v511_v1 = vadd.f32 1.0, %v347_v57  ;;  %v159_v12 = vmul.f32 0.5, %v461_v4  ;;  %v55_v30 = vmul.f32 %v39_v10, %v39_v10 }
  0x30   :  { %v351_v2 = vpop.eup %350  ;;  %300 = vst [vmem:[%s585_s1 + $0x20] sm:$0xff] %v284_v43  ;;  %v176_v3 = vmul.f32 %v499_v58, %v499_v58  ;;  %v518_v5 = vadd.f32 1.0, %v349_v61  ;;  %v102_v9 = vadd.f32 %v86_v63, %v473_v19  ;;  %v160_v62 = vmul.f32 0.5, %v499_v58 }
  0x31   :  { %v353_v6 = vpop.eup %352  ;;  %301 = vst [vmem:[%s585_s1 + $0x28] sm:$0xff] %v285_v54  ;;  %v270_v8 = vadd.f32 1.0, %v351_v2  ;;  %v177_v59 = vmul.f32 %v511_v1, %v511_v1  ;;  %v71_v42 = vmul.f32 %v55_v30, %v39_v10  ;;  %v161_v57 = vmul.f32 0.5, %v511_v1 }
  0x32   :  { %v355_v11 = vpop.eup %354  ;;  %v192_v13 = vmul.f32 %v176_v3, %v499_v58  ;;  %v178_v14 = vmul.f32 %v518_v5, %v518_v5  ;;  %v531_v15 = vadd.f32 1.0, %v353_v6  ;;  %v118_v22 = vmul.f32 0.7978846, %v102_v9 }
  0x33   :  { %v357_v16 = vpop.eup %356  ;;  %v286_v17 = vmul.f32 %v270_v8, %v158_v0  ;;  %v193_v18 = vmul.f32 %v177_v59, %v511_v1  ;;  %v534_v21 = vadd.f32 1.0, %v355_v11  ;;  %v87_v46 = vmul.f32 0.044715, %v71_v42 }
  0x34   :  { %v359_v19 = vpop.eup %358  ;;  %v271_v23 = vadd.f32 1.0, %v357_v16  ;;  %v208_v25 = vmul.f32 0.044715, %v192_v13  ;;  %v194_v26 = vmul.f32 %v178_v14, %v518_v5  ;;  %v179_v27 = vmul.f32 %v531_v15, %v531_v15 }
  0x35   :  { %302 = vst [vmem:[%s585_s1 + $0x30] sm:$0xff] %v286_v17  ;;  %v209_v4 = vmul.f32 0.044715, %v193_v18  ;;  %v180_v28 = vmul.f32 %v534_v21, %v534_v21  ;;  %v149_v34 = vadd.f32 1.0, %v359_v19  ;;  %360 = vtanh.f32 %v118_v22 }
  0x36   :  { %v287_v32 = vmul.f32 %v271_v23, %v159_v12  ;;  %v224_v33 = vadd.f32 %v208_v25, %v499_v58  ;;  %v210_v35 = vmul.f32 0.044715, %v194_v26  ;;  %v195_v38 = vmul.f32 %v179_v27, %v531_v15 }
  0x37   :  { %v225_v36 = vadd.f32 %v209_v4, %v511_v1  ;;  %v196_v39 = vmul.f32 %v180_v28, %v534_v21  ;;  %v181_v24 = vmul.f32 %v149_v34, %v149_v34  ;;  %v103_v48 = vadd.f32 %v87_v46, %v504_v60 }
  0x38   :  { %303 = vst [vmem:[%s585_s1 + $0x38] sm:$0xff] %v287_v32  ;;  %v240_v40 = vmul.f32 0.7978846, %v224_v33  ;;  %v226_v49 = vadd.f32 %v210_v35, %v518_v5  ;;  %v211_v29 = vmul.f32 0.044715, %v195_v38  ;;  %v162_v63 = vmul.f32 0.5, %v518_v5 }
  0x39   :  { %v241_v50 = vmul.f32 0.7978846, %v225_v36  ;;  %v212_v41 = vmul.f32 0.044715, %v196_v39  ;;  %v197_v20 = vmul.f32 %v181_v24, %v149_v34  ;;  %v119_v37 = vmul.f32 0.7978846, %v103_v48 }
  0x3a   :  { %362 = vtanh.f32 %v240_v40  ;;  %v242_v7 = vmul.f32 0.7978846, %v226_v49  ;;  %v227_v44 = vadd.f32 %v211_v29, %v531_v15  ;;  %v163_v59 = vmul.f32 0.5, %v531_v15 }
  0x3b   :  { %364 = vtanh.f32 %v241_v50  ;;  %v228_v45 = vadd.f32 %v212_v41, %v534_v21  ;;  %v213_v47 = vmul.f32 0.044715, %v197_v20  ;;  %v361_v51 = vpop.eup %360  ;;  %v164_v11 = vmul.f32 0.5, %v534_v21 }
  0x3c   :  { %366 = vtanh.f32 %v242_v7  ;;  %v243_v52 = vmul.f32 0.7978846, %v227_v44  ;;  %v150_v55 = vadd.f32 1.0, %v361_v51  ;;  %v165_v16 = vmul.f32 0.5, %v149_v34 }
  0x3d   :  { %v244_v53 = vmul.f32 0.7978846, %v228_v45  ;;  %v229_v31 = vadd.f32 %v213_v47, %v149_v34 }
  0x3e   :  { %368 = vtanh.f32 %v243_v52  ;;  %v182_v61 = vmul.f32 %v150_v55, %v150_v55  ;;  %v166_v28 = vmul.f32 0.5, %v150_v55 }
  0x3f   :  { %370 = vtanh.f32 %v244_v53  ;;  %v245_v43 = vmul.f32 0.7978846, %v229_v31 }
  0x40   :  { %v363_v56 = vpop.eup %362  ;;  %372 = vtanh.f32 %v119_v37  ;;  %v198_v60 = vmul.f32 %v182_v61, %v150_v55 }
  0x41   :  { %v365_v54 = vpop.eup %364  ;;  %v272_v0 = vadd.f32 1.0, %v363_v56  ;;  %374 = vtanh.f32 %v245_v43 }
  0x42   :  { %v367_v2 = vpop.eup %366  ;;  %v273_v3 = vadd.f32 1.0, %v365_v54  ;;  %v214_v9 = vmul.f32 0.044715, %v198_v60 }
  0x43   :  { %v288_v6 = vmul.f32 %v272_v0, %v160_v62  ;;  %v274_v8 = vadd.f32 1.0, %v367_v2 }
  0x44   :  { %v289_v58 = vmul.f32 %v273_v3, %v161_v57  ;;  %v369_v10 = vpop.eup %368  ;;  %v230_v13 = vadd.f32 %v214_v9, %v150_v55 }
  0x45   :  { %304 = vst [vmem:[%s585_s1 + $0x40] sm:$0xff] %v288_v6  ;;  %v290_v1 = vmul.f32 %v274_v8, %v162_v63  ;;  %v371_v5 = vpop.eup %370  ;;  %v275_v12 = vadd.f32 1.0, %v369_v10 }
  0x46   :  { %305 = vst [vmem:[%s585_s1 + $0x48] sm:$0xff] %v289_v58  ;;  %v373_v14 = vpop.eup %372  ;;  %v276_v15 = vadd.f32 1.0, %v371_v5  ;;  %v246_v22 = vmul.f32 0.7978846, %v230_v13 }
  0x47   :  { %306 = vst [vmem:[%s585_s1 + $0x50] sm:$0xff] %v290_v1  ;;  %v375_v17 = vpop.eup %374  ;;  %v291_v18 = vmul.f32 %v275_v12, %v163_v59  ;;  %v151_v19 = vadd.f32 1.0, %v373_v14 }
  0x48   :  { %v292_v23 = vmul.f32 %v276_v15, %v164_v11  ;;  %v277_v21 = vadd.f32 1.0, %v375_v17  ;;  %376 = vtanh.f32 %v246_v22 }
  0x49   :  { %307 = vst [vmem:[%s585_s1 + $0x58] sm:$0xff] %v291_v18  ;;  %v183_v25 = vmul.f32 %v151_v19, %v151_v19  ;;  %v167_v36 = vmul.f32 0.5, %v151_v19 }
  0x4a   :  { %308 = vst [vmem:[%s585_s1 + $0x60] sm:$0xff] %v292_v23  ;;  %v293_v26 = vmul.f32 %v277_v21, %v165_v16 }
  0x4b   :  { %v199_v4 = vmul.f32 %v183_v25, %v151_v19 }
  0x4c   :  { %309 = vst [vmem:[%s585_s1 + $0x68] sm:$0xff] %v293_v26 }
  0x4d   :  { %v215_v27 = vmul.f32 0.044715, %v199_v4 }
  0x4e   :  { %v377_v30 = vpop.eup %376 }
  0x4f   :  { %v231_v32 = vadd.f32 %v215_v27, %v151_v19  ;;  %v278_v33 = vadd.f32 1.0, %v377_v30 }
  0x51   :  { %v247_v35 = vmul.f32 0.7978846, %v231_v32  ;;  %v294_v34 = vmul.f32 %v278_v33, %v166_v28 }
  0x53   :  { %378 = vtanh.f32 %v247_v35  ;;  %310 = vst [vmem:[%s585_s1 + $0x70] sm:$0xff] %v294_v34 }
  0x59   :  { %v379_v38 = vpop.eup %378 }
  0x5a   :  { %v279_v39 = vadd.f32 1.0, %v379_v38 }
  0x5c   :  { %v295_v40 = vmul.f32 %v279_v39, %v167_v36 }
  0x5e   :  { %311 = vst [vmem:[%s585_s1 + $0x78] sm:$0xff] %v295_v40 }

</bundles_post_ra>
